<compile_context>
chip_gen: v6e
topology: v6e:2x2x1
jax: 0.10.0
libtpu: 0.0.40
codegen_flags: <defaults>
</compile_context>

<pallas_src>
import jax
import jax.numpy as jnp
from jax.experimental import pallas as pl
from jax.experimental.pallas import tpu as pltpu

EPS = 1e-5


# ----------------------------------------------------------------------------
# Kernel
# ----------------------------------------------------------------------------
def _prenorm_linear_kernel(x_ref, g_ref, beta_ref, w_ref, b_ref, o_ref, y_ref):
    """Grid = (row_tiles i, out_col_tiles j).

    x_ref:    (TM, D)   input row tile (fetched once per i, reused across j)
    g_ref:    (1, D)    LayerNorm gamma (resident, single-buffered)
    beta_ref: (1, D)    LayerNorm beta  (resident, single-buffered)
    w_ref:    (D, TN)   Linear weight tile (resident if grid_n == 1, else streamed over j)
    b_ref:    (1, TN)   Linear bias tile
    o_ref:    (TM, TN)  output tile
    y_ref:    (TM, D)   VMEM scratch: normalized rows, reused across all j steps
    """
    j = pl.program_id(1)

    # LayerNorm once per row tile; cached in VMEM so Dout-streaming steps only
    # pay the matmul.  Stats always in fp32 (PyTorch LayerNorm semantics:
    # biased variance, eps inside rsqrt).
    @pl.when(j == 0)
    def _():
        x = x_ref[...].astype(jnp.float32)
        mean = jnp.mean(x, axis=-1, keepdims=True)
        centered = x - mean
        var = jnp.mean(centered * centered, axis=-1, keepdims=True)
        xhat = centered * jax.lax.rsqrt(var + EPS)
        y = xhat * g_ref[...].astype(jnp.float32) + beta_ref[...].astype(jnp.float32)
        # NOTE: rows past N in the last partial row tile hold garbage; they only
        # ever map to masked-out output rows, so anything produced there is
        # benign.  Do not "fix" this by removing the row tiling.
        y_ref[...] = y.astype(y_ref.dtype)

    # fn = Linear(dim, dim): MXU matmul in the weight's native dtype (bf16
    # weights -> bf16 MXU fast path), fp32 accumulation.
    w = w_ref[...]
    out = jnp.dot(y_ref[...].astype(w.dtype), w, preferred_element_type=jnp.float32)
    out = out + b_ref[...].astype(jnp.float32)
    o_ref[...] = out.astype(o_ref.dtype)


# ----------------------------------------------------------------------------
# Spec helpers (pipeline_mode is applied when the running JAX supports it)
# ----------------------------------------------------------------------------
def _buffered(n):
    try:
        return pl.Buffered(n)
    except Exception:  # very old/odd builds: just use the default pipelining
        return None


def _spec(shape, index_map, pipeline_mode=None):
    if pipeline_mode is None:
        return pl.BlockSpec(shape, index_map)
    try:
        return pl.BlockSpec(shape, index_map, pipeline_mode=pipeline_mode)
    except TypeError:
        return pl.BlockSpec(shape, index_map)


def _tpu_vmem_bytes():
    """Generation-aware VMEM capacity (128 MiB v5e/v6e, 64 MiB per-core v7x)."""
    try:
        cap = int(pltpu.get_tpu_info().vmem_capacity_bytes)
        if cap > 0:
            return cap
    except Exception:
        pass
    return 64 * 1024 * 1024  # conservative fallback (v7x per-core)


def _choose_tiles(N, D, Dout_p, x_itemsize, w_itemsize, out_itemsize, tm, tn):
    """Pick (TM, TN) from an honest VMEM model and return the scoped limit."""
    vmem_cap = _tpu_vmem_bytes()
    usable = int(vmem_cap * 0.85)  # headroom for compiler-internal scratch

    # Sublane packing of the input dtype: 8 rows f32, 16 bf16, 32 int8/fp8.
    sub = {1: 32, 2: 16, 4: 8}.get(int(x_itemsize), 8)

    # --- TN: keep the weight resident only if it comfortably fits; else stream ---
    if tn is None:
        if D * Dout_p * w_itemsize <= usable // 3:
            tn = Dout_p
        else:
            tn_max = ((usable // 3) // max(2 * D * w_itemsize, 1)) // 128 * 128
            tn = min(Dout_p, max(128, tn_max), 1024)
    tn = int(min(tn, Dout_p))
    grid_n = pl.cdiv(Dout_p, tn)

    # Fixed (row-tile independent) VMEM: weight/bias tiles (+ gamma/beta).
    w_bufs = 1 if grid_n == 1 else 2        # single-buffered when resident
    fixed = (w_bufs * D * tn * w_itemsize   # weight tile(s)
             + w_bufs * tn * 4              # bias tile(s)
             + 2 * D * 4)                   # gamma + beta

    # Per-row working set: double-buffered x/out tiles, y scratch, fp32 body
    # intermediates (x_f32 + centered/xhat + fp32 out).
    per_row = (2 * D * x_itemsize
               + 2 * tn * out_itemsize
               + D * w_itemsize
               + 4 * (2 * D + tn))

    if tm is None:
        tm = (usable - fixed) // max(per_row, 1)
        tm = max(sub, min(int(tm), 1024))

    # Keep grid_m >= 2 (>= 4 when rows allow) so DMA pipelining and v7x's
    # second TensorCore have work.
    if N >= 4 * sub:
        cap = ((pl.cdiv(N, 4) + sub - 1) // sub) * sub
        tm = min(tm, cap)
    elif N >= 2 * sub:
        cap = ((pl.cdiv(N, 2) + sub - 1) // sub) * sub
        tm = min(tm, cap)
    tm = int(min(tm, N))
    if tm < N:
        tm = max(sub, (tm // sub) * sub)  # sublane-aligned tile when tiling

    grid_m = pl.cdiv(N, tm)

    est = fixed + tm * per_row
    vmem_limit = int(min(max(32 * 1024 * 1024, est * 5 // 4),
                         int(vmem_cap * 0.9)))
    return tm, tn, grid_m, grid_n, vmem_limit


# ----------------------------------------------------------------------------
# Parameter preparation (hoisted out of the per-call hot path)
# ----------------------------------------------------------------------------
def prepare_linear_params(w, b, *, from_torch_layout=False, matmul_dtype=None):
    """Transpose/pad/cast the Linear parameters ONCE at init time.

    w: (D, Dout) — or PyTorch nn.Linear's (Dout, D) if from_torch_layout=True.
    Returns (w_p, b_p, dout) with w_p: (D, Dout_p), Dout_p a multiple of 128
    (lane-dense, unmasked stores).  Pass matmul_dtype=jnp.bfloat16 to hit the
    bf16 MXU fast path on compute-bound shapes.
    """
    if from_torch_layout:
        w = w.T
    if matmul_dtype is not None:
        w = w.astype(matmul_dtype)
    D, dout = w.shape
    dout_p = pl.cdiv(dout, 128) * 128
    if dout_p != dout:
        w = jnp.zeros((D, dout_p), w.dtype).at[:, :dout].set(w)
        b = jnp.zeros((dout_p,), b.dtype).at[:dout].set(b)
    return w, b, dout


# ----------------------------------------------------------------------------
# Wrappers
# ----------------------------------------------------------------------------
def prenorm_linear_prepared(x, gamma, beta, w_p, b_p, dout, *, tm=None, tn=None):
    """x: (B, S, D) -> (B, S, dout) using pre-padded params from prepare_linear_params."""
    B, S, D = x.shape
    Dout_p = w_p.shape[1]
    N = B * S

    x2 = x.reshape(N, D)
    g2 = gamma.reshape(1, D)
    be2 = beta.reshape(1, D)
    b2 = b_p.reshape(1, Dout_p)

    x_isz = jnp.dtype(x.dtype).itemsize
    w_isz = jnp.dtype(w_p.dtype).itemsize
    o_isz = jnp.dtype(x.dtype).itemsize

    tm, tn, grid_m, grid_n, vmem_limit = _choose_tiles(
        N, D, Dout_p, x_isz, w_isz, o_isz, tm, tn)

    # Grid-invariant operands get a single pipeline buffer; streamed ones keep
    # the default double-buffering.
    resident = (grid_n == 1)
    in_specs = [
        _spec((tm, D), lambda i, j: (i, 0)),                             # x (per-i)
        _spec((1, D), lambda i, j: (0, 0), _buffered(1)),                # gamma
        _spec((1, D), lambda i, j: (0, 0), _buffered(1)),                # beta
        _spec((D, tn), lambda i, j: (0, j),
              _buffered(1) if resident else None),                       # weight
        _spec((1, tn), lambda i, j: (0, j),
              _buffered(1) if resident else None),                       # bias
    ]
    out_specs = pl.BlockSpec((tm, tn), lambda i, j: (i, j))

    out = pl.pallas_call(
        _prenorm_linear_kernel,
        out_shape=jax.ShapeDtypeStruct((N, Dout_p), x.dtype),
        grid_spec=pltpu.PrefetchScalarGridSpec(
            num_scalar_prefetch=0,
            grid=(grid_m, grid_n),
            in_specs=in_specs,
            out_specs=out_specs,
            scratch_shapes=[pltpu.VMEM((tm, D), w_p.dtype)],  # normalized rows
        ),
        compiler_params=pltpu.CompilerParams(
            # rows independent -> megacore-shardable; Dout axis stays in order
            # so the y scratch computed at j == 0 is valid for all j.
            dimension_semantics=("parallel", "arbitrary"),
            vmem_limit_bytes=vmem_limit,
        ),
    )(x2, g2, be2, w_p, b2)

    if Dout_p != dout:
        out = out[:, :dout]
    return out.reshape(B, S, dout)


def prenorm_linear(x, gamma, beta, w, b, *, tm=None, tn=None):
    """Convenience wrapper (pads per call).  In production call
    prepare_linear_params() once at init and use prenorm_linear_prepared()."""
    w_p, b_p, dout = prepare_linear_params(w, b)
    return prenorm_linear_prepared(x, gamma, beta, w_p, b_p, dout, tm=tm, tn=tn)


# ----------------------------------------------------------------------------
# Reference + smoke tests
# ----------------------------------------------------------------------------
def _reference(x, gamma, beta, w, b):
    xf = x.astype(jnp.float32)
    mean = jnp.mean(xf, axis=-1, keepdims=True)
    var = jnp.mean((xf - mean) ** 2, axis=-1, keepdims=True)
    y = (xf - mean) * jax.lax.rsqrt(var + EPS) * gamma.astype(jnp.float32) \
        + beta.astype(jnp.float32)
    out = jnp.dot(y, w.astype(jnp.float32),
                  precision=jax.lax.Precision.HIGHEST) + b.astype(jnp.float32)
    return out.astype(x.dtype)


if __name__ == "__main__":
    key = jax.random.PRNGKey(0)

    # --- Small shape matching the module spec: batch=2, seq=8, hidden(dim)=32 ---
    B, S, D = 2, 8, 32
    Dout = D
    kx, kw, kb, kx2, kg2, kb2 = jax.random.split(key, 6)
    x = jax.random.normal(kx, (B, S, D), dtype=jnp.float32)

    # LayerNorm params: PyTorch default init (weight=1, bias=0)
    gamma = jnp.ones((D,), dtype=jnp.float32)
    beta = jnp.zeros((D,), dtype=jnp.float32)

    # fn = Linear(dim, dim), deterministic init; kernel layout is (D, Dout)
    # (use prepare_linear_params(from_torch_layout=True) for PyTorch (Dout, D)).
    w = jax.random.normal(kw, (D, Dout), dtype=jnp.float32) * 0.02
    b = jax.random.normal(kb, (Dout,), dtype=jnp.float32) * 0.01

    out = prenorm_linear(x, gamma, beta, w, b)
    jax.block_until_ready(out)
    ref = _reference(x, gamma, beta, w, b)
    assert out.shape == (B, S, Dout)
    assert jnp.allclose(out, ref, atol=1e-4, rtol=1e-4)

    # --- Larger shape: exercise the 2-D grid with a streamed weight (grid_n > 1) ---
    B2, S2, D2 = 2, 512, 256          # N = 1024 rows, lane-dense D/Dout
    x_big = jax.random.normal(kx2, (B2, S2, D2), dtype=jnp.float32)
    g_big = 1.0 + 0.1 * jax.random.normal(kg2, (D2,), dtype=jnp.float32)
    be_big = 0.1 * jax.random.normal(kb2, (D2,), dtype=jnp.float32)
    w_big = jax.random.normal(kw, (D2, D2), dtype=jnp.float32) * 0.02
    b_big = jax.random.normal(kb, (D2,), dtype=jnp.float32) * 0.01

    # Hoisted param prep (done once), then explicit tiles forcing grid_n = 2.
    w_p, b_p, dout_big = prepare_linear_params(w_big, b_big)
    out_big = prenorm_linear_prepared(x_big, g_big, be_big, w_p, b_p, dout_big,
                                      tm=128, tn=128)
    jax.block_until_ready(out_big)
    ref_big = _reference(x_big, g_big, be_big, w_big, b_big)
    assert out_big.shape == (B2, S2, D2)
    assert jnp.allclose(out_big, ref_big, atol=2e-3, rtol=2e-3)

    # --- Same shape, auto-chosen tiles (resident weight, multi-row-tile grid) ---
    out_auto = prenorm_linear_prepared(x_big, g_big, be_big, w_p, b_p, dout_big)
    jax.block_until_ready(out_auto)
    assert jnp.allclose(out_auto, ref_big, atol=2e-3, rtol=2e-3)

    print("KERNEL_OK")
</pallas_src>

<mosaic_0001>
module attributes {stable_mosaic.version = 11 : i64} {
  func.func @_prenorm_linear_kernel(%arg0: i32, %arg1: i32, %arg2: memref<8x32xf32, #tpu.memory_space<vmem>>, %arg3: memref<1x32xf32, #tpu.memory_space<vmem>>, %arg4: memref<1x32xf32, #tpu.memory_space<vmem>>, %arg5: memref<32x128xf32, #tpu.memory_space<vmem>>, %arg6: memref<1x128xf32, #tpu.memory_space<vmem>>, %arg7: memref<8x128xf32, #tpu.memory_space<vmem>>, %arg8: memref<8x32xf32, #tpu.memory_space<vmem>>) attributes {dimension_semantics = [#tpu.dimension_semantics<parallel>, #tpu.dimension_semantics<arbitrary>], iteration_bounds = array<i64: 2, 1>, scalar_prefetch = 0 : i64, scratch_operands = 1 : i64, tpu.core_type = #tpu.core_type<tc>, window_params = [{transform_indices = @transform_0, window_bounds = array<i64: 8, 32>}, {pipeline_mode = #tpu.pipeline_mode<synchronous>, transform_indices = @transform_1, window_bounds = array<i64: 1, 32>}, {pipeline_mode = #tpu.pipeline_mode<synchronous>, transform_indices = @transform_2, window_bounds = array<i64: 1, 32>}, {pipeline_mode = #tpu.pipeline_mode<synchronous>, transform_indices = @transform_3, window_bounds = array<i64: 32, 128>}, {pipeline_mode = #tpu.pipeline_mode<synchronous>, transform_indices = @transform_4, window_bounds = array<i64: 1, 128>}, {transform_indices = @transform_5, window_bounds = array<i64: 8, 128>}]} {
    %c0_i32 = arith.constant 0 : i32
    %0 = arith.cmpi eq, %arg1, %c0_i32 : i32
    %1 = arith.extui %0 : i1 to i32
    %c0_i32_0 = arith.constant 0 : i32
    %2 = arith.cmpi ne, %1, %c0_i32_0 : i32
    scf.if %2 {
      %c0_8 = arith.constant 0 : index
      %c0_9 = arith.constant 0 : index
      %10 = vector.load %arg2[%c0_8, %c0_9] : memref<8x32xf32, #tpu.memory_space<vmem>>, vector<8x32xf32>
      %cst_10 = arith.constant dense<0.000000e+00> : vector<8xf32>
      %11 = vector.multi_reduction <add>, %10, %cst_10 [1] : vector<8x32xf32> to vector<8xf32>
      %12 = vector.shape_cast %11 : vector<8xf32> to vector<8x1xf32>
      %cst_11 = arith.constant 3.200000e+01 : f32
      %13 = vector.broadcast %cst_11 : f32 to vector<8x1xf32>
      %14 = arith.divf %12, %13 : vector<8x1xf32>
      %15 = vector.broadcast %14 : vector<8x1xf32> to vector<8x32xf32>
      %16 = arith.subf %10, %15 : vector<8x32xf32>
      %17 = arith.mulf %16, %16 : vector<8x32xf32>
      %cst_12 = arith.constant dense<0.000000e+00> : vector<8xf32>
      %18 = vector.multi_reduction <add>, %17, %cst_12 [1] : vector<8x32xf32> to vector<8xf32>
      %19 = vector.shape_cast %18 : vector<8xf32> to vector<8x1xf32>
      %cst_13 = arith.constant 3.200000e+01 : f32
      %20 = vector.broadcast %cst_13 : f32 to vector<8x1xf32>
      %21 = arith.divf %19, %20 : vector<8x1xf32>
      %cst_14 = arith.constant 9.99999974E-6 : f32
      %22 = vector.broadcast %cst_14 : f32 to vector<8x1xf32>
      %23 = arith.addf %21, %22 : vector<8x1xf32>
      %24 = math.rsqrt %23 : vector<8x1xf32>
      %25 = vector.broadcast %24 : vector<8x1xf32> to vector<8x32xf32>
      %26 = arith.mulf %16, %25 : vector<8x32xf32>
      %c0_15 = arith.constant 0 : index
      %c0_16 = arith.constant 0 : index
      %27 = vector.load %arg3[%c0_15, %c0_16] : memref<1x32xf32, #tpu.memory_space<vmem>>, vector<1x32xf32>
      %28 = vector.broadcast %27 : vector<1x32xf32> to vector<8x32xf32>
      %29 = arith.mulf %26, %28 : vector<8x32xf32>
      %c0_17 = arith.constant 0 : index
      %c0_18 = arith.constant 0 : index
      %30 = vector.load %arg4[%c0_17, %c0_18] : memref<1x32xf32, #tpu.memory_space<vmem>>, vector<1x32xf32>
      %31 = vector.broadcast %30 : vector<1x32xf32> to vector<8x32xf32>
      %32 = arith.addf %29, %31 : vector<8x32xf32>
      %c0_19 = arith.constant 0 : index
      %c0_20 = arith.constant 0 : index
      %33 = vector.load %arg8[%c0_19, %c0_20] : memref<8x32xf32, #tpu.memory_space<vmem>>, vector<8x32xf32>
      tpu.vector_store %arg8[%c0_19, %c0_20], %32 {strides = array<i32>} : memref<8x32xf32, #tpu.memory_space<vmem>>, vector<8x32xf32>,
    } else {
    }
    %c0 = arith.constant 0 : index
    %c0_1 = arith.constant 0 : index
    %3 = vector.load %arg5[%c0, %c0_1] : memref<32x128xf32, #tpu.memory_space<vmem>>, vector<32x128xf32>
    %c0_2 = arith.constant 0 : index
    %c0_3 = arith.constant 0 : index
    %4 = vector.load %arg8[%c0_2, %c0_3] : memref<8x32xf32, #tpu.memory_space<vmem>>, vector<8x32xf32>
    %cst = arith.constant dense<0.000000e+00> : vector<8x128xf32>
    %5 = tpu.matmul %4, %3, %cst {dimension_numbers = #tpu.dot_dimension_numbers<[1], [0], [0], [1], [0, 0, 1, 1], [], []>} : vector<8x32xf32>, vector<32x128xf32>, vector<8x128xf32> -> vector<8x128xf32>
    %c0_4 = arith.constant 0 : index
    %c0_5 = arith.constant 0 : index
    %6 = vector.load %arg6[%c0_4, %c0_5] : memref<1x128xf32, #tpu.memory_space<vmem>>, vector<1x128xf32>
    %7 = vector.broadcast %6 : vector<1x128xf32> to vector<8x128xf32>
    %8 = arith.addf %5, %7 : vector<8x128xf32>
    %c0_6 = arith.constant 0 : index
    %c0_7 = arith.constant 0 : index
    %9 = vector.load %arg7[%c0_6, %c0_7] : memref<8x128xf32, #tpu.memory_space<vmem>>, vector<8x128xf32>
    tpu.vector_store %arg7[%c0_6, %c0_7], %8 {strides = array<i32>} : memref<8x128xf32, #tpu.memory_space<vmem>>, vector<8x128xf32>,
    return
  }
  func.func @transform_0(%arg0: i32, %arg1: i32) -> (i32, i32) {
    %c0_i32 = arith.constant 0 : i32
    %c0_i32_0 = arith.constant 0 : i32
    return %arg0, %c0_i32 : i32, i32
  }
  func.func @transform_1(%arg0: i32, %arg1: i32) -> (i32, i32) {
    %c0_i32 = arith.constant 0 : i32
    %c0_i32_0 = arith.constant 0 : i32
    %c0_i32_1 = arith.constant 0 : i32
    return %c0_i32, %c0_i32_0 : i32, i32
  }
  func.func @transform_2(%arg0: i32, %arg1: i32) -> (i32, i32) {
    %c0_i32 = arith.constant 0 : i32
    %c0_i32_0 = arith.constant 0 : i32
    %c0_i32_1 = arith.constant 0 : i32
    return %c0_i32, %c0_i32_0 : i32, i32
  }
  func.func @transform_3(%arg0: i32, %arg1: i32) -> (i32, i32) {
    %c0_i32 = arith.constant 0 : i32
    %c0_i32_0 = arith.constant 0 : i32
    return %c0_i32, %arg1 : i32, i32
  }
  func.func @transform_4(%arg0: i32, %arg1: i32) -> (i32, i32) {
    %c0_i32 = arith.constant 0 : i32
    %c0_i32_0 = arith.constant 0 : i32
    return %c0_i32, %arg1 : i32, i32
  }
  func.func @transform_5(%arg0: i32, %arg1: i32) -> (i32, i32) {
    %c0_i32 = arith.constant 0 : i32
    return %arg0, %arg1 : i32, i32
  }
}

</mosaic_0001>

<bundles_post_ra>
// kernel: tpu_custom_call.1
= control target key start
LH: loop header
LB: loop body
LE: loop exit
PB: predicated region body
PF: predicated region fallthrough
CT: control target
= control target key end

     0   :  { %s1014_s0 = inlined_call_operand.hbm [shape: f32[16,32], index: 0, kind: input, shape index: {}]   ;;  %s1015_s1 = inlined_call_operand.vmem [shape: f32[1,32], index: 1, kind: input, shape index: {}]   ;;  %s1016_s2 = inlined_call_operand.vmem [shape: f32[1,32], index: 2, kind: input, shape index: {}]   ;;  %s1017_s3 = inlined_call_operand.hbm [shape: f32[32,128], index: 3, kind: input, shape index: {}]   ;;  %s1018_s4 = inlined_call_operand.vmem [shape: f32[1,128], index: 4, kind: input, shape index: {}]   ;;  %s1019_s5 = inlined_call_operand.hbm [shape: f32[16,128], index: 5, kind: output, shape index: {}]  }
   0x1   :  { %1022 = sst [smem:[#allocation13_spill]] %s1017_s3 }
   0x2   :  { %10 = vsyncpa [#allocation4], 0 }
   0x3   :  { %12 = vsyncpa [#allocation4 + $0x1], 0 }
   0x4   :  { %13 = vsyncpa [#allocation7], 0 }
   0x5   :  { %14 = vsyncpa [#allocation5], 0 }
   0x6   :  { %16 = vsyncpa [#allocation5 + $0x1], 0  ;;  %s824_s18 = smov 0   ;;  %s826_s19 = smov 0  }
   0x7   :  { %s828_s20 = smov 0   ;;  %s830_s21 = smov 0  }
   0x8   :  { %s832_s22 = smov 0   ;;  %s834_s23 = smov 0  }
   0x9 LB: > { %s532_s24 = sadd.s32 4294967295, %s785_s23   ;;  %s533_s25 = sadd.s32 4294967294, %s785_s23   ;;  %s785_s23 = sphi %s834_s23, %s22_s23   ;;  %s781_s22 = sphi %s832_s22, %s1042_s22   ;;  %s777_s21 = sphi %s830_s21, %s1041_s21   ;;  %s773_s20 = sphi %s828_s20, %s1040_s20   ;;  %s769_s19 = sphi %s826_s19, %s1039_s19   ;;  %s765_s18 = sphi %s824_s18, %s1038_s18  }
   0xa   : > { %p54_p0 = scmp.ne.s32.totalorder %s769_s19, %s765_s18  ;;  %p858_p1 = scmp.eq.s32.totalorder %s532_s24, 0 }
   0xb   : > { %p862_p2 = scmp.eq.s32.totalorder %s532_s24, 1  ;;  %p180_p3 = scmp.eq.s32.totalorder %s533_s25, 1 }
   0xc   : > { %p868_p4 = por %p858_p1, %p54_p0  ;;  %p534_p5 = scmp.ge.s32.totalorder %s785_s23, 1 }
   0xd   : > { %p873_p6 = por %p180_p3, %p54_p0  ;;  %p187_p7 = scmp.lt.s32.totalorder %s785_s23, 3 }
   0xe   : > { %s1025_s28 = scalar_select %p868_p4, 1, 0 }
   0xf   : > { %s1026_s29 = scalar_select %p873_p6, 1, 0 }
  0x10   : > { %p878_p8 = pnand %p534_p5, %p187_p7  ;;  %s787_s6 = smov [#allocation6]  }
  0x11   : > { %s207_s7 = sshll.u32 %s787_s6, 4  ;;  %s34_s9 = sadd.s32 1, %s781_s22  ;;  %s208_s7 = int_to_ptr.vmem [resolvable:$true] %s207_s7 }
  0x12   : > { %p576_p9 = pneg %p878_p8  ;;  %s658_s10 = scalar_lea.vmem %s208_s7, 512 }
  0x13   : > { %p659_p13 = scmp.ne.s32.totalorder %s208_s7, %s658_s10  ;;  %p666_p5 = scmp.lt.s32.totalorder %s208_s7, %s208_s7 }
  0x14   : > { %p887_p11 = pnand %p576_p9, %p858_p1  ;;  %p667_p7 = scmp.lt.s32.totalorder %s658_s10, %s658_s10 }
  0x16   : > { %p649_p12 = pneg %p887_p11  ;;  %p668_p6 = por %p667_p7, %p666_p5 }
  0x18   : > { %p661_p0 = pnand %p659_p13, %p649_p12 }
  0x1a   : > { %p662_p3 = pneg %p661_p0 }
  0x1c   : > { %p669_p4 = pnand %p668_p6, %p662_p3 }
  0x1e   : > { %672 = shalt.err (!%p669_p4)
}
  0x1f   : > { %s788_s11 = smov 128   ;;  %s789_s12 = smov 8  }
  0x20   : > { %s1029_s3 = sld [smem:[#allocation13_spill]]  ;;  %p36_p6 = scmp.ge.s32.totalorder %s34_s9, 2 }
  0x21   : > { %s41_s15 = sadd.s32 1, %s773_s20  ;;  %p48_p4 = scmp.ne.s32.totalorder %s773_s20, %s769_s19 }
  0x22   : > { %p49_p9 = scmp.eq.s32.totalorder %s785_s23, 0  ;;  %s1044_s9 = smov (%p36_p6, %s34_s9), 0 }
  0x23   : > { %1030 = sst [smem:[#allocation12_spill]] %s1044_s9  ;;  %p911_p13 = por %p862_p2, %p48_p4 }
  0x24   : > { %p905_p12 = por %p49_p9, %p48_p4  ;;  %s38_s24 = ssub.s32 %s781_s22, %s1044_s9 }
  0x25   : > { %p589_p0 = scmp.lt.s32.totalorder %s785_s23, 2  ;;  %s227_s25 = sand.u32 1, %s773_s20  }
  0x26   : > { %579 = dma.hbm_to_vmem [thread:$0]  (!%p887_p11), %s1029_s3, 512, %s208_s7, [#allocation7], %s788_s11, %s788_s11, %s789_s12  }
  0x27   : > { %p39_p11 = scmp.eq.s32.totalorder %s38_s24, 0  ;;  %s538_s6 = sshll.u32 %s227_s25, 3 }
  0x28   : > { %s539_s8 = sshll.u32 %s781_s22, 7  ;;  %s231_s13 = scalar_lea.vmem [#allocation3], %s538_s6 }
  0x29   : > { %s920_s7 = scalar_select %p39_p11, %s773_s20, %s41_s15  }
  0x2a   : > { %s236_s12 = scalar_lea.hbm %s1014_s0, %s539_s8  ;;  %s238_s14 = sshll.u32 %s231_s13, 4  ;;  %s239_s14 = int_to_ptr.vmem [resolvable:$true] %s238_s14 }
  0x2b   : > { %p928_p2 = pnand %p589_p0, %p905_p12  ;;  %s228_s3 = scalar_lea.sflag [#allocation4], %s227_s25 }
  0x2c   : > { %s686_s24 = scalar_lea.vmem %s239_s14, 128  ;;  %s790_s15 = smov [#allocation3]  }
  0x2d   : > { %p675_p3 = pneg %p928_p2  ;;  %p687_p5 = scmp.ne.s32.totalorder %s239_s14, %s686_s24 }
  0x2e   : > { %s691_s9 = sshll.u32 %s790_s15, 4  ;;  %s692_s9 = int_to_ptr.vmem [resolvable:$false] %s691_s9 }
  0x2f   : > { %p689_p7 = pnand %p687_p5, %p675_p3  ;;  %s693_s8 = scalar_lea.vmem %s692_s9, 256 }
  0x30   : > { %p694_p4 = scmp.lt.s32.totalorder %s239_s14, %s692_s9  ;;  %p695_p9 = scmp.lt.s32.totalorder %s693_s8, %s686_s24 }
  0x31   : > { %p690_p6 = pneg %p689_p7 }
  0x32   : > { %p696_p11 = por %p695_p9, %p694_p4 }
  0x34   : > { %p697_p10 = pnand %p696_p11, %p690_p6 }
  0x36   : > { %700 = shalt.err (!%p697_p10)
}
  0x37   : > { %583 = dma.hbm_to_vmem [thread:$0]  (!%p928_p2), %s236_s12, 128, %s239_s14, %s228_s3  }
  0x38   : > { %247 = sbr.rel (%p878_p8) target bundleno = 589 (0x24d), region = 40  ;;  %s939_s16 = sand.u32 (!%p878_p8), 1, %s769_s19  }
  0x39   : > { %s541_s25 = sshll.u32 (!%p878_p8), %s939_s16, 3  ;;  %s250_s6 = scalar_lea.sflag (!%p878_p8), [#allocation4], %s939_s16 }
  0x3a   : > { %s253_s9 = scalar_lea.vmem (!%p878_p8), [#allocation3], %s541_s25  ;;  %p1034_p12 = scmp.ne.s32.totalorder (!%p878_p8), %s1025_s28, 0 }
  0x3d   : > { %752 = dma.done.wait (%p1034_p12), %s250_s6, 128  }
  0x3e   : > { %754 = vsyncadd (%p1034_p12), %s250_s6, 4294967168 }
  0x3f   : > { %756 = dma.done.wait (%p858_p1), [#allocation7], 512  }
  0x40   : > { %758 = vsyncadd (%p858_p1), [#allocation7], 4294966784  ;;  %vm295_vm0 = vcmask 261120   ;;  %v294_v0 = vld [vmem:[%s253_s9] sm:$0xff]  ;;  %v791_v7 = vmov 0.0   ;;  %vm792_vm1 = vmmov 0  }
  0x41   : > { %v296_v1 = vsel %vm295_vm0, %v294_v0, 0.0  ;;  %557 = vmatprep.subr.mxu0 %v791_v7  ;;  %v330_v8 = vld [vmem:[#allocation6 + $0x18] sm:$0xff]  ;;  %v329_v9 = vld [vmem:[#allocation6 + $0x10] sm:$0xff]  ;;  %565 = vmatprep.mubr.msk.f32.mxu0 %vm792_vm1, %v791_v7  ;;  %v328_v10 = vld [vmem:[#allocation6 + $0x8] sm:$0xff]  ;;  %s549_s12 = sshll.u32 %s777_s21, 7  ;;  %s286_s13 = scalar_lea.vmem [#allocation8], %s541_s25 }
  0x42   : > { %297 = vadd.xlane.f32.xlu0 %v296_v1  ;;  %558 = vmatpush3.msra.mxu0 %v330_v8  ;;  %v327_v11 = vld [vmem:[#allocation6] sm:$0xff]  ;;  %v544_v16 = vld [vmem:[%s1015_s1] ss:$0 sm:$0xff]  ;;  %s429_s14 = sshll.u32 %s286_s13, 4  ;;  %s972_s15 = scalar_lea.hbm %s1019_s5, %s549_s12  ;;  %s430_s14 = int_to_ptr.vmem [resolvable:$true] %s429_s14 }
  0x43   : > { %559 = vmatprep.subr.mxu0 %v791_v7  ;;  %v545_v18 = vld [vmem:[%s1016_s2] ss:$0 sm:$0xff]  ;;  %s415_s8 = scalar_lea.sflag [#allocation5], %s939_s16  ;;  %s701_s6 = scalar_lea.vmem %s430_s14, 128 }
  0x44   : > { %560 = vmatpush3.msra.mxu0 %v329_v9  ;;  %v546_v22 = vld [vmem:[%s1018_s4] ss:$0 sm:$0xff]  ;;  %p702_p1 = scmp.ne.s32.totalorder %s430_s14, %s701_s6  ;;  %s793_s21 = smov [#allocation8]  }
  0x45   : > { %561 = vmatprep.subr.mxu0 %v791_v7  ;;  %s705_s9 = sshll.u32 %s793_s21, 4  ;;  %s706_s9 = int_to_ptr.vmem [resolvable:$false] %s705_s9 }
  0x46   : > { %562 = vmatpush3.msra.mxu0 %v328_v10  ;;  %p703_p8 = pnand %p702_p1, %p911_p13  ;;  %s707_s25 = scalar_lea.vmem %s706_s9, 256 }
  0x47   : > { %563 = vmatprep.subr.mxu0 %v791_v7  ;;  %p708_p0 = scmp.lt.s32.totalorder %s430_s14, %s706_s9  ;;  %p709_p2 = scmp.lt.s32.totalorder %s707_s25, %s701_s6 }
  0x48   : > { %564 = vmatpush3.msra.mxu0 %v327_v11  ;;  %p704_p10 = pneg %p703_p8 }
  0x49   : > { %p710_p3 = por %p709_p2, %p708_p0 }
  0x4b   : > { %p711_p5 = pnand %p710_p3, %p704_p10 }
  0xcb   : > { %v298_v2 = vpop.xlane.xlu0 %297 }
  0xcc   : > { %v300_v3 = vmul.f32 0.03125, %v298_v2 }
  0xce   : > { %v301_v4 = vsub.f32 %v294_v0, %v300_v3 }
  0xd0   : > { %v302_v5 = vmul.f32 %v301_v4, %v301_v4 }
  0xd2   : > { %v303_v6 = vsel %vm295_vm0, %v302_v5, 0.0 }
  0xd3   : > { %304 = vadd.xlane.f32.xlu0 %v303_v6 }
 0x15c   : > { %v305_v12 = vpop.xlane.xlu0 %304 }
 0x15d   : > { %v306_v13 = vmul.f32 0.03125, %v305_v12 }
 0x15f   : > { %v307_v14 = vadd.f32 1e-05, %v306_v13 }
 0x161   : > { %645 = vrsqrt.f32 %v307_v14 }
 0x16e   : > { %v646_v15 = vpop.eup %645 }
 0x16f   : > { %v309_v17 = vmul.f32 %v646_v15, %v301_v4 }
 0x171   : > { %v317_v19 = vmul.f32 %v544_v16, %v309_v17 }
 0x173   : > { %v325_v20 = vadd.f32 %v545_v18, %v317_v19 }
 0x175   : > { %326 = vst.msk [vmem:[#allocation2] sm:$0xff] %vm295_vm0, %v325_v20 }
 0x17c   : > { %v331_v21 = vld [vmem:[#allocation2] sm:$0xff] }
 0x17d   : > { %566 = vmatmul.mubr.msk.f32.vlgmr.msra.gmra.mxu0 %vm295_vm0, %v331_v21 }
 0x23d   : > { %v409_v23 = vpop.f32.mrf.mxu0 }
 0x23e   : > { %v410_v24 = vadd.f32 %v546_v22, %v409_v23 }
 0x23f   : > { %v567_v25 = vpop.f32.mrf.mxu0 }
 0x240   : > { %413 = vst [vmem:[%s286_s13] sm:$0xff] %v410_v24 }
 0x241   : > { %714 = shalt.err (!%p711_p5)
}
 0x242   : > { %s715_s3 = scalar_lea.hbm %s972_s15, 128  ;;  %s719_s28 = scalar_lea.hbm %s1019_s5, 256 }
 0x243   : > { %p716_p7 = scmp.ne.s32.totalorder %s972_s15, %s715_s3  ;;  %p720_p9 = scmp.lt.s32.totalorder %s972_s15, %s1019_s5 }
 0x244   : > { %p721_p11 = scmp.lt.s32.totalorder %s719_s28, %s715_s3 }
 0x245   : > { %p717_p6 = pnand %p716_p7, %p911_p13 }
 0x246   : > { %p722_p12 = por %p721_p11, %p720_p9 }
 0x247   : > { %p718_p4 = pneg %p717_p6 }
 0x249   : > { %p723_p1 = pnand %p722_p12, %p718_p4 }
 0x24b   : > { %726 = shalt.err (!%p723_p1)
}
 0x24c   : > { %574 = dma.vmem_to_hbm [thread:$0]  (%p911_p13), %s430_s14, 128, %s972_s15, %s415_s8  }
 0x24d PF: > { %s441_s11 = sand.u32 1, %s765_s18   ;;  %p1035_p8 = scmp.ne.s32.totalorder %s1026_s29, 0 }
 0x24e   : > { %p1036_p10 = scmp.ge.s32.totalorder %s785_s23, 2  ;;  %s442_s12 = scalar_lea.sflag [#allocation5], %s441_s11 }
 0x250   : > { %p585_p0 = pnand %p1036_p10, %p1035_p8 }
 0x252   : > { %p586_p2 = pneg %p585_p0 }
 0x254   : > { %760 = dma.done.wait (%p586_p2), %s442_s12, 128  }
 0x255   : > { %762 = vsyncadd (%p586_p2), %s442_s12, 4294967168  ;;  %s22_s23 = sadd.s32 1, %s785_s23   ;;  %s1037_s17 = sld [smem:[#allocation12_spill]] }
 0x256   : > { %p19_p3 = scmp.ge.s32.totalorder %s22_s23, 4   ;;  %s1038_s18 = smov %s769_s19 }
 0x257   : > { %s1039_s19 = smov %s773_s20  ;;  %s1040_s20 = smov %s920_s7 }
 0x258   : > { %s1041_s21 = smov %s781_s22  ;;  %21 = sbr.rel (!%p19_p3) target bundleno = 9 (0x9), region = 97 }
 0x25b   : > { %s1042_s22 = smov %s1037_s17 }
 0x25d   :  { %447 = vsyncpa [#allocation4], 1 }
 0x25e   :  { %449 = vsyncpa [#allocation4 + $0x1], 1 }
 0x25f   :  { %450 = vsyncpa [#allocation7], 1 }
 0x260   :  { %451 = vsyncpa [#allocation5], 1 }
 0x261   :  { %453 = vsyncpa [#allocation5 + $0x1], 1 }

</bundles_post_ra>
